<compile_context>
chip_gen: v7x
topology: tpu7x:2x2x1
jax: 0.10.0
libtpu: 0.0.40
codegen_flags: <defaults>
</compile_context>

<pallas_src>
import functools
import math

import jax
import jax.numpy as jnp
from jax.experimental import pallas as pl
from jax.experimental.pallas import tpu as pltpu


def _round_up(x, m):
    return (x + m - 1) // m * m


_MIB = 1024 * 1024
# Keep E VMEM-resident only below this (unpadded) size; the budget below
# assumes the pipeline double-buffers it, so even 2x E + A/acc/out tiles stay
# inside v7x's 64 MiB physical VMEM (v5e/v6e have 128 MiB).
_RESIDENT_E_BYTES = 16 * _MIB
_VMEM_LIMIT_FLOOR = 32 * _MIB
_VMEM_LIMIT_CAP = 56 * _MIB


# ---------------------------------------------------------------------------
# Propagation-layer kernel:
#   out_f32  = acc_in + scale * (A @ E)          (fused running layer sum)
#   nxt_bf16 = (scale * (A @ E)).astype(bf16)    (next layer's input)
# The f32 output block is the K-reduction accumulator (no scratch).
# ---------------------------------------------------------------------------
def _layer_matmul_kernel(a_ref, e_ref, acc_ref, out_ref, nxt_ref, *,
                         tk, a_scale, e_resident):
    k = pl.program_id(1)

    @pl.when(k == 0)
    def _():
        out_ref[...] = jnp.zeros_like(out_ref)

    if e_resident:
        # E was DMA'd once (constant index_map) and stays VMEM-resident;
        # slice the k-th K block in place.
        off = pl.multiple_of(k * tk, tk)
        e_blk = e_ref[pl.ds(off, tk), :]
    else:
        e_blk = e_ref[...]

    a_blk = a_ref[...]
    if a_blk.dtype != e_blk.dtype:
        # Quantized A: dequantize on the VPU (kernel is HBM-bound, so free).
        # The scalar scale is applied once after the K reduction.
        a_blk = a_blk.astype(jnp.float32).astype(e_blk.dtype)

    out_ref[...] += jnp.dot(a_blk, e_blk, preferred_element_type=jnp.float32)

    @pl.when(k == pl.num_programs(1) - 1)
    def _():
        prop = out_ref[...]
        if a_scale != 1.0:
            prop = prop * a_scale
        nxt_ref[...] = prop.astype(nxt_ref.dtype)     # next-layer operand
        out_ref[...] = prop + acc_ref[...]            # fused running sum


def _make_layer_matmul(n_pad, d_pad, tm, tk, *, a_dtype, a_scale, e_resident):
    grid = (n_pad // tm, n_pad // tk)
    a_item = jnp.dtype(a_dtype).itemsize

    if e_resident:
        e_spec = pl.BlockSpec((n_pad, d_pad), lambda i, k: (0, 0))
        e_vmem = 2 * n_pad * d_pad * 2
        e_hbm = n_pad * d_pad * 2                      # fetched once
    else:
        e_spec = pl.BlockSpec((tk, d_pad), lambda i, k: (k, 0))
        e_vmem = 2 * tk * d_pad * 2
        e_hbm = (n_pad // tm) * n_pad * d_pad * 2      # re-streamed per M tile

    vmem_need = (2 * tm * tk * a_item                  # A tiles (double buf)
                 + e_vmem                              # E operand
                 + 2 * tm * d_pad * 4                  # running-sum input
                 + 2 * tm * d_pad * 4                  # f32 output tiles
                 + 2 * tm * d_pad * 2)                 # bf16 output tiles
    vmem_limit = int(min(max(int(vmem_need * 1.25), _VMEM_LIMIT_FLOOR),
                         _VMEM_LIMIT_CAP))

    flops = 2 * n_pad * n_pad * d_pad
    bytes_accessed = int(n_pad * n_pad * a_item        # A
                         + e_hbm                       # E (incl. re-reads)
                         + n_pad * d_pad * 4           # running-sum input
                         + n_pad * d_pad * (4 + 2))    # f32 + bf16 outputs

    kernel = functools.partial(_layer_matmul_kernel, tk=tk,
                               a_scale=float(a_scale), e_resident=e_resident)

    return pl.pallas_call(
        kernel,
        out_shape=(jax.ShapeDtypeStruct((n_pad, d_pad), jnp.float32),
                   jax.ShapeDtypeStruct((n_pad, d_pad), jnp.bfloat16)),
        grid_spec=pltpu.PrefetchScalarGridSpec(
            num_scalar_prefetch=0,
            grid=grid,
            in_specs=[
                pl.BlockSpec((tm, tk), lambda i, k: (i, k)),       # A tile
                e_spec,                                            # E operand
                pl.BlockSpec((tm, d_pad), lambda i, k: (i, 0)),    # acc in
            ],
            out_specs=[
                pl.BlockSpec((tm, d_pad), lambda i, k: (i, 0)),    # acc out
                pl.BlockSpec((tm, d_pad), lambda i, k: (i, 0)),    # next E
            ],
        ),
        compiler_params=pltpu.CompilerParams(
            dimension_semantics=("parallel", "arbitrary"),
            vmem_limit_bytes=vmem_limit),
        cost_estimate=pl.CostEstimate(flops=flops, transcendentals=0,
                                      bytes_accessed=bytes_accessed),
    )


# ---------------------------------------------------------------------------
# Graph preparation (hoisted out of forward: pad + cast/quantize once).
# ---------------------------------------------------------------------------
def prepare_graph(graph, *, a_dtype=jnp.bfloat16, tm=512, tk=1024):
    """a_dtype: bf16 (default) or int8 (halves A HBM bytes; fixed 1/127 scale
    since normalized-adjacency entries lie in [0, 1]).
    For n >~ 64k (streamed-E regime) pass tm=1024 to further cut E re-reads.
    """
    # TODO(synk): float8_e4m3fn A variant for v7x's native-fp8 MXU.
    n = graph.shape[0]
    n_pad0 = _round_up(n, 128)
    blk = tm * tk // math.gcd(tm, tk)
    if n_pad0 >= blk:
        n_pad = _round_up(n, blk)
    else:
        # Small graph: single K block; split M in two (when it stays a
        # multiple of 128) so v7x's two TensorCores both get a row tile.
        n_pad = n_pad0
        tk = n_pad
        tm = n_pad // 2 if n_pad % 256 == 0 else n_pad

    if jnp.dtype(a_dtype) == jnp.int8:
        a_scale = 1.0 / 127.0
        q = jnp.clip(jnp.round(graph * 127.0), -127, 127).astype(jnp.int8)
        a_pad = jnp.zeros((n_pad, n_pad), jnp.int8).at[:n, :n].set(q)
    else:
        a_scale = 1.0
        a_pad = jnp.zeros((n_pad, n_pad), a_dtype).at[:n, :n].set(
            graph.astype(a_dtype))
    return dict(a=a_pad, a_scale=a_scale, n=n, n_pad=n_pad, tm=tm, tk=tk)


def lightgcn_propagate(prep, embed, num_layers, *, resident_e=None):
    """embed: (N, D) -> (N, D) mean of [E, A E, ..., A^L E]."""
    n, d = embed.shape
    assert n == prep["n"]
    n_pad, tm, tk = prep["n_pad"], prep["tm"], prep["tk"]
    d_pad = _round_up(d, 128)
    if resident_e is None:
        resident_e = n_pad * d_pad * 2 <= _RESIDENT_E_BYTES

    e_pad = jnp.zeros((n_pad, d_pad), jnp.float32).at[:n, :d].set(
        embed.astype(jnp.float32))

    layer = _make_layer_matmul(n_pad, d_pad, tm, tk,
                               a_dtype=prep["a"].dtype,
                               a_scale=prep["a_scale"],
                               e_resident=resident_e)

    acc = e_pad                                  # layer-0 term of the mean
    cur = e_pad.astype(jnp.bfloat16)
    for _ in range(num_layers):
        acc, cur = layer(prep["a"], cur, acc)    # fused A@cur, +=, bf16 cast
    out = acc * (1.0 / float(num_layers + 1))
    return out[:n, :d]


# ---------------------------------------------------------------------------
# Score kernel: batch-tiled, lane-dense (1, tb) stores.
# ---------------------------------------------------------------------------
def _score_kernel(u_ref, i_ref, o_ref):
    o_ref[...] = jnp.sum(u_ref[...] * i_ref[...], axis=0, keepdims=True)


def lightgcn_score(user_emb, item_emb, *, tb=512):
    """user_emb, item_emb: (B, D) f32 -> scores (B,) f32."""
    b, d = user_emb.shape
    d_pad = _round_up(d, 8)
    tb = min(tb, _round_up(b, 128))
    b_pad = _round_up(b, tb)
    # B on the lane axis -> lane-dense stores (layout plumbing, not compute).
    ut = jnp.zeros((d_pad, b_pad), jnp.float32).at[:d, :b].set(user_emb.T)
    it = jnp.zeros((d_pad, b_pad), jnp.float32).at[:d, :b].set(item_emb.T)
    out = pl.pallas_call(
        _score_kernel,
        out_shape=jax.ShapeDtypeStruct((1, b_pad), jnp.float32),
        grid=(b_pad // tb,),
        in_specs=[pl.BlockSpec((d_pad, tb), lambda j: (0, j)),
                  pl.BlockSpec((d_pad, tb), lambda j: (0, j))],
        out_specs=pl.BlockSpec((1, tb), lambda j: (0, j)),
        compiler_params=pltpu.CompilerParams(
            dimension_semantics=("parallel",)),
    )(ut, it)
    return out[0, :b]


# ---------------------------------------------------------------------------
# Forward (mirrors LightGCN.forward(users, items))
# ---------------------------------------------------------------------------
def lightgcn_forward(prep, user_weight, item_weight, users, items, num_layers,
                     *, resident_e=None):
    num_user = user_weight.shape[0]
    embed = jnp.concatenate([user_weight, item_weight], axis=0)       # (N, D)
    out = lightgcn_propagate(prep, embed, num_layers,
                             resident_e=resident_e)                   # (N, D)
    # TODO(synk): for large batches, fuse this row gather into the score
    # kernel via PrefetchScalarGridSpec(num_scalar_prefetch=2) + pl.Element.
    u_emb = jnp.take(out[:num_user], users, axis=0)                   # (B, D)
    i_emb = jnp.take(out[num_user:], items, axis=0)                   # (B, D)
    return lightgcn_score(u_emb, i_emb)                               # (B,)


# ---------------------------------------------------------------------------
# Deterministic synthetic setup (replaces Dataset + nn.Embedding init)
# ---------------------------------------------------------------------------
def build_norm_adj(R):
    """Dense normalized adjacency D^{-1/2} A D^{-1/2}, A = [[0, R], [R^T, 0]]."""
    num_user, num_item = R.shape
    upper = jnp.concatenate(
        [jnp.zeros((num_user, num_user), jnp.float32), R], axis=1)
    lower = jnp.concatenate(
        [R.T, jnp.zeros((num_item, num_item), jnp.float32)], axis=1)
    adj = jnp.concatenate([upper, lower], axis=0)
    rowsum = adj.sum(axis=1)
    d_inv = jnp.where(rowsum > 0, rowsum ** -0.5, 0.0)
    return d_inv[:, None] * adj * d_inv[None, :]


def xavier_normal(key, shape):
    fan_out, fan_in = shape                 # (num_embeddings, embedding_dim)
    std = (2.0 / float(fan_in + fan_out)) ** 0.5
    return std * jax.random.normal(key, shape, dtype=jnp.float32)


# ---------------------------------------------------------------------------
# Pure-JAX f32 reference (kernel uses bf16/int8 A -> loose tolerances)
# ---------------------------------------------------------------------------
def reference_forward(graph, user_weight, item_weight, users, items, num_layers):
    num_user = user_weight.shape[0]
    embed = jnp.concatenate([user_weight, item_weight], axis=0)
    embs = [embed]
    cur = embed
    for _ in range(num_layers):
        cur = graph @ cur
        embs.append(cur)
    out = jnp.mean(jnp.stack(embs, axis=1), axis=1)
    u = out[:num_user][users]
    i = out[num_user:][items]
    return (u * i).sum(axis=1)


# ---------------------------------------------------------------------------
if __name__ == "__main__":
    NUM_USER = 64
    NUM_ITEM = 96
    EMB_DIM = 32
    LAYERS = 3
    BATCH = 16

    key = jax.random.PRNGKey(0)
    k_r, k_u, k_i, k_bu, k_bi = jax.random.split(key, 5)

    # Synthetic binary user-item interaction matrix (replaces file I/O).
    R = jax.random.bernoulli(k_r, p=0.1,
                             shape=(NUM_USER, NUM_ITEM)).astype(jnp.float32)
    graph = build_norm_adj(R)                              # (160, 160)

    user_weight = xavier_normal(k_u, (NUM_USER, EMB_DIM))
    item_weight = xavier_normal(k_i, (NUM_ITEM, EMB_DIM))
    users = jax.random.randint(k_bu, (BATCH,), 0, NUM_USER, dtype=jnp.int32)
    items = jax.random.randint(k_bi, (BATCH,), 0, NUM_ITEM, dtype=jnp.int32)

    ref = reference_forward(graph, user_weight, item_weight, users, items,
                            LAYERS)

    # 1) Default config: bf16 A, adaptive small-graph tiling, resident E.
    prep = prepare_graph(graph)
    scores = jax.block_until_ready(
        lightgcn_forward(prep, user_weight, item_weight, users, items, LAYERS))
    assert scores.shape == (BATCH,)
    assert bool(jnp.all(jnp.isfinite(scores)))
    assert jnp.allclose(scores, ref, atol=2e-2, rtol=5e-2), (scores, ref)

    # 2) int8-quantized A + multi-tile grid (exercises the K reduction and the
    #    resident-E dynamic slice).  Quantization noise -> looser tolerance.
    prep_i8 = prepare_graph(graph, a_dtype=jnp.int8, tm=128, tk=128)
    scores_i8 = jax.block_until_ready(
        lightgcn_forward(prep_i8, user_weight, item_weight, users, items,
                         LAYERS))
    assert jnp.allclose(scores_i8, ref, atol=8e-2, rtol=2e-1), (scores_i8, ref)

    # 3) Streamed-E fallback path (what very large graphs take when E exceeds
    #    the resident-E VMEM budget).
    prep_s = prepare_graph(graph, tm=128, tk=128)
    scores_s = jax.block_until_ready(
        lightgcn_forward(prep_s, user_weight, item_weight, users, items,
                         LAYERS, resident_e=False))
    assert jnp.allclose(scores_s, ref, atol=2e-2, rtol=5e-2), (scores_s, ref)

    print("KERNEL_OK")
</pallas_src>

<mosaic_0001>
module attributes {stable_mosaic.version = 11 : i64} {
  func.func @_layer_matmul_kernel(%arg0: i32, %arg1: i32, %arg2: memref<128x256xbf16, #tpu.memory_space<vmem>>, %arg3: memref<256x128xbf16, #tpu.memory_space<vmem>>, %arg4: memref<128x128xf32, #tpu.memory_space<vmem>>, %arg5: memref<128x128xf32, #tpu.memory_space<vmem>>, %arg6: memref<128x128xbf16, #tpu.memory_space<vmem>>) attributes {dimension_semantics = [#tpu.dimension_semantics<parallel>, #tpu.dimension_semantics<arbitrary>], iteration_bounds = array<i64: 2, 1>, scalar_prefetch = 0 : i64, scratch_operands = 0 : i64, tpu.core_type = #tpu.core_type<tc>, window_params = [{transform_indices = @transform_0, window_bounds = array<i64: 128, 256>}, {pipeline_mode = #tpu.pipeline_mode<synchronous>, transform_indices = @transform_1, window_bounds = array<i64: 256, 128>}, {transform_indices = @transform_2, window_bounds = array<i64: 128, 128>}, {transform_indices = @transform_3, window_bounds = array<i64: 128, 128>}, {transform_indices = @transform_4, window_bounds = array<i64: 128, 128>}]} {
    %c0_i32 = arith.constant 0 : i32
    %0 = arith.cmpi eq, %arg1, %c0_i32 : i32
    %1 = arith.extui %0 : i1 to i32
    %c0_i32_0 = arith.constant 0 : i32
    %2 = arith.cmpi ne, %1, %c0_i32_0 : i32
    scf.if %2 {
      %cst_9 = arith.constant 0.000000e+00 : f32
      %15 = vector.broadcast %cst_9 : f32 to vector<128x128xf32>
      %c0_10 = arith.constant 0 : index
      %c0_11 = arith.constant 0 : index
      %16 = vector.load %arg5[%c0_10, %c0_11] : memref<128x128xf32, #tpu.memory_space<vmem>>, vector<128x128xf32>
      tpu.vector_store %arg5[%c0_10, %c0_11], %15 {strides = array<i32>} : memref<128x128xf32, #tpu.memory_space<vmem>>, vector<128x128xf32>,
    } else {
    }
    %c256_i32 = arith.constant 256 : i32
    %3 = arith.muli %arg1, %c256_i32 : i32
    %4 = tpu.assume_multiple %3, 256 : i32
    %5 = arith.index_cast %4 : i32 to index
    %c0 = arith.constant 0 : index
    %6 = vector.load %arg3[%5, %c0] : memref<256x128xbf16, #tpu.memory_space<vmem>>, vector<256x128xbf16>
    %c0_1 = arith.constant 0 : index
    %c0_2 = arith.constant 0 : index
    %7 = vector.load %arg2[%c0_1, %c0_2] : memref<128x256xbf16, #tpu.memory_space<vmem>>, vector<128x256xbf16>
    %c0_3 = arith.constant 0 : index
    %c0_4 = arith.constant 0 : index
    %8 = vector.load %arg5[%c0_3, %c0_4] : memref<128x128xf32, #tpu.memory_space<vmem>>, vector<128x128xf32>
    %cst = arith.constant dense<0.000000e+00> : vector<128x128xf32>
    %9 = tpu.matmul %7, %6, %cst {dimension_numbers = #tpu.dot_dimension_numbers<[1], [0], [0], [1], [0, 0, 1, 1], [], []>} : vector<128x256xbf16>, vector<256x128xbf16>, vector<128x128xf32> -> vector<128x128xf32>
    %10 = arith.addf %8, %9 : vector<128x128xf32>
    %c0_5 = arith.constant 0 : index
    %c0_6 = arith.constant 0 : index
    %11 = vector.load %arg5[%c0_5, %c0_6] : memref<128x128xf32, #tpu.memory_space<vmem>>, vector<128x128xf32>
    tpu.vector_store %arg5[%c0_5, %c0_6], %10 {strides = array<i32>} : memref<128x128xf32, #tpu.memory_space<vmem>>, vector<128x128xf32>,
    %c0_i32_7 = arith.constant 0 : i32
    %12 = arith.cmpi eq, %arg1, %c0_i32_7 : i32
    %13 = arith.extui %12 : i1 to i32
    %c0_i32_8 = arith.constant 0 : i32
    %14 = arith.cmpi ne, %13, %c0_i32_8 : i32
    scf.if %14 {
      %c0_9 = arith.constant 0 : index
      %c0_10 = arith.constant 0 : index
      %15 = vector.load %arg5[%c0_9, %c0_10] : memref<128x128xf32, #tpu.memory_space<vmem>>, vector<128x128xf32>
      %16 = arith.truncf %15 : vector<128x128xf32> to vector<128x128xbf16>
      %c0_11 = arith.constant 0 : index
      %c0_12 = arith.constant 0 : index
      %17 = vector.load %arg6[%c0_11, %c0_12] : memref<128x128xbf16, #tpu.memory_space<vmem>>, vector<128x128xbf16>
      tpu.vector_store %arg6[%c0_11, %c0_12], %16 {strides = array<i32>} : memref<128x128xbf16, #tpu.memory_space<vmem>>, vector<128x128xbf16>,
      %c0_13 = arith.constant 0 : index
      %c0_14 = arith.constant 0 : index
      %18 = vector.load %arg4[%c0_13, %c0_14] : memref<128x128xf32, #tpu.memory_space<vmem>>, vector<128x128xf32>
      %19 = arith.addf %15, %18 : vector<128x128xf32>
      %c0_15 = arith.constant 0 : index
      %c0_16 = arith.constant 0 : index
      %20 = vector.load %arg5[%c0_15, %c0_16] : memref<128x128xf32, #tpu.memory_space<vmem>>, vector<128x128xf32>
      tpu.vector_store %arg5[%c0_15, %c0_16], %19 {strides = array<i32>} : memref<128x128xf32, #tpu.memory_space<vmem>>, vector<128x128xf32>,
    } else {
    }
    return
  }
  func.func @transform_0(%arg0: i32, %arg1: i32) -> (i32, i32) {
    %c0_i32 = arith.constant 0 : i32
    return %arg0, %arg1 : i32, i32
  }
  func.func @transform_1(%arg0: i32, %arg1: i32) -> (i32, i32) {
    %c0_i32 = arith.constant 0 : i32
    %c0_i32_0 = arith.constant 0 : i32
    %c0_i32_1 = arith.constant 0 : i32
    return %c0_i32, %c0_i32_0 : i32, i32
  }
  func.func @transform_2(%arg0: i32, %arg1: i32) -> (i32, i32) {
    %c0_i32 = arith.constant 0 : i32
    %c0_i32_0 = arith.constant 0 : i32
    return %arg0, %c0_i32 : i32, i32
  }
  func.func @transform_3(%arg0: i32, %arg1: i32) -> (i32, i32) {
    %c0_i32 = arith.constant 0 : i32
    %c0_i32_0 = arith.constant 0 : i32
    return %arg0, %c0_i32 : i32, i32
  }
  func.func @transform_4(%arg0: i32, %arg1: i32) -> (i32, i32) {
    %c0_i32 = arith.constant 0 : i32
    %c0_i32_0 = arith.constant 0 : i32
    return %arg0, %c0_i32 : i32, i32
  }
}

</mosaic_0001>

<bundles_post_ra>
// kernel: tpu_custom_call.1
= control target key start
LH: loop header
LB: loop body
LE: loop exit
PB: predicated region body
PF: predicated region fallthrough
CT: control target
= control target key end

     0   :  { %10 = vsyncpa [#allocation3], 0  ;;  %s2007_s0 = inlined_call_operand.hbm [shape: bf16[256,256], index: 0, kind: input, shape index: {}]   ;;  %s2008_s1 = inlined_call_operand.hbm [shape: bf16[256,128], index: 1, kind: input, shape index: {}]   ;;  %s2009_s2 = inlined_call_operand.hbm [shape: f32[256,128], index: 2, kind: input, shape index: {}]   ;;  %s2010_s3 = inlined_call_operand.hbm [shape: f32[256,128], index: 3, kind: output, shape index: {0}]   ;;  %s2011_s4 = inlined_call_operand.hbm [shape: bf16[256,128], index: 4, kind: output, shape index: {1}]  }
   0x1   :  { %12 = vsyncpa [#allocation3 + $0x1], 0 }
   0x2   :  { %13 = vsyncpa [#allocation6], 0 }
   0x3   :  { %14 = vsyncpa [#allocation4], 0 }
   0x4   :  { %16 = vsyncpa [#allocation4 + $0x1], 0 }
   0x5   :  { %17 = vsyncpa [#allocation10], 0 }
   0x6   :  { %19 = vsyncpa [#allocation10 + $0x1], 0  ;;  %s1630_s15 = smov 0   ;;  %s1632_s16 = smov 0  }
   0x7   :  { %s1634_s17 = smov 0   ;;  %s1636_s18 = smov 0  }
   0x8   :  { %s1638_s19 = smov 0   ;;  %s1640_s20 = smov 0  }
   0x9 LB: > { %s37_s21 = sadd.s32 1, %s1586_s19  ;;  %s46_s22 = sadd.s32 1, %s1578_s17  ;;  %s1590_s20 = sphi %s1640_s20, %s25_s20   ;;  %s1586_s19 = sphi %s1638_s19, %s2037_s19   ;;  %s1582_s18 = sphi %s1636_s18, %s2036_s18   ;;  %s1578_s17 = sphi %s1634_s17, %s2035_s17   ;;  %s1574_s16 = sphi %s1632_s16, %s2034_s16   ;;  %s1570_s15 = sphi %s1630_s15, %s2033_s15  }
   0xa   : > { %p39_p0 = scmp.ge.s32.totalorder %s37_s21, 2  ;;  %p53_p1 = scmp.ne.s32.totalorder %s1578_s17, %s1574_s16 }
   0xb   : > { %p54_p2 = scmp.eq.s32.totalorder %s1590_s20, 0  ;;  %p1279_p5 = scmp.lt.s32.totalorder %s1590_s20, 2 }
   0xc   : > { %s2039_s21 = smov (%p39_p0, %s37_s21), 0  ;;  %s195_s24 = sand.u32 1, %s1590_s20  }
   0xd   : > { %p55_p4 = por %p54_p2, %p53_p1  ;;  %s41_s23 = ssub.s32 %s1586_s19, %s2039_s21 }
   0xe   : > { %p44_p6 = scmp.eq.s32.totalorder %s41_s23, 0  ;;  %s197_s25 = sand.u32 1, %s1578_s17  }
   0xf   : > { %s1101_s26 = sshll.u32 %s1586_s19, 11  ;;  %s1680_s28 = sshll.u32 %s197_s25, 7 }
  0x10   : > { %s1678_s27 = scalar_select %p44_p6, %s1578_s17, %s46_s22  }
  0x11   : > { %s1687_s5 = scalar_lea.hbm %s2007_s0, %s1101_s26  ;;  %p1689_p7 = pnand %p1279_p5, %p55_p4 }
  0x12   : > { %s199_s7 = scalar_lea.vmem [#allocation2], %s1680_s28  ;;  %s1696_s9 = scalar_lea.sflag [#allocation3], %s195_s24 }
  0x13   : > { %s209_s8 = sshll.u32 %s199_s7, 4  ;;  %s1380_s10 = scalar_lea.hbm %s1687_s5, 2048  ;;  %s1694_s8 = int_to_ptr.vmem [resolvable:$true] %s209_s8 }
  0x14   : > { %p1381_p8 = scmp.ne.s32.totalorder %s1687_s5, %s1380_s10  ;;  %p1382_p9 = pneg %p1689_p7 }
  0x15   : > { %s1385_s13 = scalar_lea.hbm %s2007_s0, 4096  ;;  %p1386_p12 = scmp.lt.u32.totalorder %s1687_s5, %s2007_s0 }
  0x16   : > { %p1383_p10 = pnand %p1382_p9, %p1381_p8  ;;  %p1387_p13 = scmp.lt.u32.totalorder %s1385_s13, %s1380_s10 }
  0x17   : > { %p1389_p2 = scmp.lt.u32.totalorder %s1380_s10, %s1687_s5 }
  0x18   : > { %p1384_p11 = pneg %p1383_p10  ;;  %p1388_p0 = por %p1387_p13, %p1386_p12 }
  0x1a   : > { %p1390_p4 = por %p1389_p2, %p1388_p0 }
  0x1c   : > { %p1391_p5 = pnand %p1390_p4, %p1384_p11 }
  0x1e   : > { %1394 = shalt.err (!%p1391_p5)
}
  0x1f   : > { %s1395_s23 = scalar_lea.vmem %s1694_s8, 2048  ;;  %s1592_s24 = smov [#allocation2]  }
  0x20   : > { %p1396_p6 = scmp.ne.s32.totalorder %s1694_s8, %s1395_s23  ;;  %s1400_s25 = sshll.u32 %s1592_s24, 4  ;;  %s1401_s25 = int_to_ptr.vmem [resolvable:$false] %s1400_s25 }
  0x21   : > { %s1402_s29 = scalar_lea.vmem %s1401_s25, 4096  ;;  %p1403_p3 = scmp.lt.s32.totalorder %s1694_s8, %s1401_s25 }
  0x22   : > { %p1398_p8 = pnand %p1396_p6, %p1382_p9  ;;  %p1404_p12 = scmp.lt.s32.totalorder %s1402_s29, %s1395_s23 }
  0x24   : > { %p1399_p10 = pneg %p1398_p8  ;;  %p1405_p13 = por %p1404_p12, %p1403_p3 }
  0x26   : > { %p1406_p0 = pnand %p1405_p13, %p1399_p10 }
  0x28   : > { %1409 = shalt.err (!%p1406_p0)
}
  0x29   : > { %s2012_s30 = smov 128   ;;  %s1594_s7 = smov 8  }
  0x2a   : > { %1267 = dma.hbm_to_vmem [thread:$0]  (!%p1689_p7), %s1687_s5, 2048, %s1694_s8, %s1696_s9, %s2012_s30, %s2012_s30, %s1594_s7  }
  0x2b   : > { %s1732_s12 = scalar_lea.hbm %s2009_s2, %s1101_s26  ;;  %s223_s13 = scalar_lea.vmem [#allocation7], %s1680_s28 }
  0x2c   : > { %s230_s14 = sshll.u32 %s223_s13, 4  ;;  %s1738_s22 = sadd.s32 4294967295, %s1590_s20   ;;  %s1735_s14 = int_to_ptr.vmem [resolvable:$true] %s230_s14 }
  0x2d   : > { %s1027_s23 = sadd.s32 4294967294, %s1590_s20   ;;  %p59_p3 = scmp.ne.s32.totalorder %s1574_s16, %s1570_s15 }
  0x2e   : > { %p2013_p11 = scmp.eq.s32.totalorder %s1738_s22, 0  ;;  %p130_p2 = scmp.eq.s32.totalorder %s1738_s22, 1 }
  0x2f   : > { %p136_p4 = scmp.eq.s32.totalorder %s1027_s23, 1  ;;  %p1028_p5 = scmp.ge.s32.totalorder %s1590_s20, 1 }
  0x30   : > { %p1748_p6 = por %p2013_p11, %p59_p3  ;;  %p1755_p8 = por %p130_p2, %p53_p1 }
  0x31   : > { %p1759_p10 = por %p136_p4, %p59_p3  ;;  %p169_p12 = scmp.lt.s32.totalorder %s1590_s20, 3 }
  0x32   : > { %s2018_s26 = scalar_select %p1748_p6, 1, 0 }
  0x33   : > { %s2019_s28 = scalar_select %p1755_p8, 1, 0 }
  0x34   : > { %s2020_s5 = scalar_select %p1759_p10, 1, 0 }
  0x35   : > { %p1764_p13 = pnand %p1028_p5, %p169_p12  ;;  %s1595_s24 = smov [#allocation5]  }
  0x36   : > { %s181_s25 = sshll.u32 %s1595_s24, 4  ;;  %s1410_s29 = scalar_lea.hbm %s1732_s12, 2048  ;;  %s1768_s25 = int_to_ptr.vmem [resolvable:$true] %s181_s25 }
  0x37   : > { %s2021_s8 = scalar_select %p1764_p13, 1, 0 }
  0x38   : > { %p1411_p0 = scmp.ne.s32.totalorder %s1732_s12, %s1410_s29  ;;  %s1415_s13 = scalar_lea.hbm %s2009_s2, 4096 }
  0x39   : > { %p1416_p4 = scmp.lt.u32.totalorder %s1732_s12, %s2009_s2  ;;  %p1417_p5 = scmp.lt.u32.totalorder %s1415_s13, %s1410_s29 }
  0x3a   : > { %p1413_p3 = pnand %p1411_p0, %p1382_p9  ;;  %p1419_p11 = scmp.lt.u32.totalorder %s1410_s29, %s1732_s12 }
  0x3b   : > { %p1418_p12 = por %p1417_p5, %p1416_p4 }
  0x3c   : > { %p1414_p2 = pneg %p1413_p3 }
  0x3d   : > { %p1420_p10 = por %p1419_p11, %p1418_p12 }
  0x3f   : > { %p1421_p8 = pnand %p1420_p10, %p1414_p2 }
  0x41   : > { %1424 = shalt.err (!%p1421_p8)
}
  0x42   : > { %s1425_s24 = scalar_lea.vmem %s1735_s14, 2048  ;;  %s1596_s10 = smov [#allocation7]  }
  0x43   : > { %p1426_p0 = scmp.ne.s32.totalorder %s1735_s14, %s1425_s24  ;;  %s1430_s11 = sshll.u32 %s1596_s10, 4  ;;  %s1431_s11 = int_to_ptr.vmem [resolvable:$false] %s1430_s11 }
  0x44   : > { %s1432_s30 = scalar_lea.vmem %s1431_s11, 4096  ;;  %p1433_p6 = scmp.lt.s32.totalorder %s1735_s14, %s1431_s11 }
  0x45   : > { %p1428_p3 = pnand %p1426_p0, %p1382_p9  ;;  %p1434_p4 = scmp.lt.s32.totalorder %s1432_s30, %s1425_s24 }
  0x47   : > { %p1429_p1 = pneg %p1428_p3  ;;  %p1435_p5 = por %p1434_p4, %p1433_p6 }
  0x49   : > { %p1436_p11 = pnand %p1435_p5, %p1429_p1 }
  0x4b   : > { %1439 = shalt.err (!%p1436_p11)
}
  0x4c   : > { %s2022_s29 = smov 128   ;;  %p2023_p9 = scmp.eq.s32.totalorder %s1738_s22, 0 }
  0x4d   : > { %1270 = dma.hbm_to_vmem [thread:$0]  (!%p1689_p7), %s1732_s12, 2048, %s1735_s14, %s1696_s9, %s2022_s29, %s2022_s29, %s1594_s7  }
  0x4e   : > { %p2024_p8 = pneg %p1764_p13  ;;  %s1440_s6 = scalar_lea.hbm %s2008_s1, 2048 }
  0x4f   : > { %p1441_p6 = scmp.ne.s32.totalorder %s2008_s1, %s1440_s6  ;;  %p1447_p12 = scmp.lt.u32.totalorder %s1440_s6, %s2008_s1 }
  0x50   : > { %p1804_p10 = pnand %p2024_p8, %p2023_p9 }
  0x52   : > { %p1442_p1 = pneg %p1804_p10 }
  0x54   : > { %p1443_p2 = pnand %p1442_p1, %p1441_p6 }
  0x56   : > { %p1444_p7 = pneg %p1443_p2 }
  0x58   : > { %p1449_p0 = pnand %p1447_p12, %p1444_p7 }
  0x5a   : > { %1452 = shalt.err (!%p1449_p0)
}
  0x5b   : > { %s1453_s12 = scalar_lea.vmem %s1768_s25, 2048  ;;  %p1461_p11 = scmp.lt.s32.totalorder %s1768_s25, %s1768_s25 }
  0x5c   : > { %p1454_p3 = scmp.ne.s32.totalorder %s1768_s25, %s1453_s12  ;;  %p1462_p9 = scmp.lt.s32.totalorder %s1453_s12, %s1453_s12 }
  0x5e   : > { %p1456_p4 = pnand %p1454_p3, %p1442_p1  ;;  %p1463_p8 = por %p1462_p9, %p1461_p11 }
  0x60   : > { %p1457_p5 = pneg %p1456_p4 }
  0x62   : > { %p1464_p13 = pnand %p1463_p8, %p1457_p5 }
  0x64   : > { %1467 = shalt.err (!%p1464_p13)
}
  0x65   : > { %s1597_s14 = smov 64   ;;  %s1598_s30 = smov 4  }
  0x66   : > { %1263 = dma.hbm_to_vmem [thread:$0]  (!%p1804_p10), %s2008_s1, 2048, %s1768_s25, [#allocation6], %s1597_s14, %s1597_s14, %s1598_s30  }
  0x67   : > { %p2026_p6 = scmp.ne.s32.totalorder %s2021_s8, 0 }
  0x68   : > { %s244_s24 = sand.u32 (!%p2026_p6), 1, %s1738_s22   ;;  %s1833_s6 = sand.u32 (!%p2026_p6), 1, %s1574_s16  }
  0x69   : > { %242 = sbr.rel (%p2026_p6) target bundleno = 435 (0x1b3), region = 32  ;;  %s1836_s10 = sshll.u32 (!%p2026_p6), %s1833_s6, 7 }
  0x6a   : > { %s245_s11 = scalar_lea.sflag (!%p2026_p6), [#allocation3], %s244_s24  ;;  %s1839_s9 = scalar_lea.vmem (!%p2026_p6), [#allocation2], %s1836_s10 }
  0x6b   : > { %p2027_p13 = scmp.ne.s32.totalorder (!%p2026_p6), %s2018_s26, 0 }
  0x70   : > { %1549 = dma.done.wait (%p2027_p13), %s245_s11, 2048  }
  0x71   : > { %1551 = vsyncadd (%p2027_p13), %s245_s11, 4294965248  ;;  %p2028_p10 = scmp.eq.s32.totalorder %s1738_s22, 0 }
  0x73   : > { %1553 = dma.done.wait (%p2028_p10), [#allocation6], 2048   ;;  %p2029_p1 = pmov %p2028_p10 }
  0x74   : > { %s1850_s8 = scalar_lea.vmem [#allocation7], %s1836_s10 }
  0x75   : > { %1555 = vsyncadd (%p2029_p1), [#allocation6], 4294965248 }
  0x76   : > { %1557 = dma.done.wait (%p2027_p13), %s245_s11, 2048  }
  0x77   : > { %1559 = vsyncadd (%p2027_p13), %s245_s11, 4294965248  ;;  %v1340_v0 = vld [vmem:[#allocation5 + $0x40] sm:$0xff]   ;;  %v1342_v2 = vld [vmem:[#allocation5 + $0x48] sm:$0xff]   ;;  %s1043_s22 = sshll.u32 %s1833_s6, 6  ;;  %s1878_s26 = scalar_lea.vmem [#allocation8], %s1836_s10 }
  0x78   : > { %v1341_v1 = vld [vmem:[#allocation5] sm:$0xff]   ;;  %1168 = vmatprep.subr.bf16.mxu0 %v1340_v0  ;;  %1232 = vmatprep.subr.bf16.mxu1 %v1340_v0  ;;  %v1343_v3 = vld [vmem:[#allocation5 + $0x8] sm:$0xff]   ;;  %v1344_v4 = vld [vmem:[#allocation5 + $0x50] sm:$0xff]   ;;  %s1882_s25 = scalar_lea.vmem [#allocation9], %s1043_s22  ;;  %s1119_s13 = sshll.u32 %s1582_s18, 11 }
  0x79   : > { %1169 = vmatpush3.bf16.msra.mxu0 %v1341_v1  ;;  %1240 = vmatpush3.bf16.msra.mxu1 %v1341_v1  ;;  %v1345_v5 = vld [vmem:[#allocation5 + $0x10] sm:$0xff]   ;;  %v1346_v6 = vld [vmem:[#allocation5 + $0x58] sm:$0xff]   ;;  %v1348_v8 = vld [vmem:[#allocation5 + $0x60] sm:$0xff]   ;;  %s862_s7 = sshll.u32 %s1878_s26, 4  ;;  %s1915_s30 = scalar_lea.hbm %s2010_s3, %s1119_s13  ;;  %s1921_s7 = int_to_ptr.vmem [resolvable:$true] %s862_s7 }
  0x7a   : > { %1170 = vmatprep.subr.bf16.mxu0 %v1342_v2  ;;  %1233 = vmatprep.subr.bf16.mxu1 %v1342_v2  ;;  %v1347_v7 = vld [vmem:[#allocation5 + $0x18] sm:$0xff]   ;;  %v1349_v9 = vld [vmem:[#allocation5 + $0x20] sm:$0xff]   ;;  %v1350_v10 = vld [vmem:[#allocation5 + $0x68] sm:$0xff]   ;;  %s1120_s29 = sshll.u32 %s1582_s18, 10  ;;  %s878_s23 = sshll.u32 %s1882_s25, 4  ;;  %s1930_s23 = int_to_ptr.vmem [resolvable:$true] %s878_s23 }
  0x7b   : > { %v1358_v11 = vld [vmem:[%s1839_s9 + $0x4] ss:$8 sps:$4 sm:$0xff]   ;;  %v1352_v14 = vld [vmem:[#allocation5 + $0x70] sm:$0xff]   ;;  %v1354_v16 = vld [vmem:[#allocation5 + $0x78] sm:$0xff]   ;;  %s1928_s18 = scalar_lea.hbm %s2011_s4, %s1120_s29  ;;  %s844_s11 = scalar_lea.sflag [#allocation4], %s1833_s6 }
  0x7c   : > { %v1361_v12 = vld [vmem:[%s1839_s9 + $0x44] ss:$8 sps:$4 sm:$0xff]   ;;  %599 = vmatprep.mubr.bf16.mxu0 %v1358_v11  ;;  %v1353_v15 = vld [vmem:[#allocation5 + $0x30] sm:$0xff]   ;;  %v1355_v17 = vld [vmem:[#allocation5 + $0x38] sm:$0xff]   ;;  %p2030_p7 = scmp.ne.s32.totalorder %s2019_s28, 0 }
  0x7d   : > { %1171 = vmatpush3.bf16.msra.mxu0 %v1343_v3  ;;  %1241 = vmatpush3.bf16.msra.mxu1 %v1343_v3  ;;  %v1351_v13 = vld [vmem:[#allocation5 + $0x28] sm:$0xff]   ;;  %v1362_v20 = vld [vmem:[%s1839_s9 + $0x14] ss:$8 sps:$4 sm:$0xff]   ;;  %v1366_v22 = vld [vmem:[%s1839_s9 + $0x10] ss:$8 sps:$4 sm:$0xff]  }
  0x7e   : > { %1172 = vmatprep.subr.bf16.mxu0 %v1344_v4  ;;  %1234 = vmatprep.subr.bf16.mxu1 %v1344_v4  ;;  %v1356_v18 = vld [vmem:[%s1839_s9] ss:$8 sps:$4 sm:$0xff]   ;;  %v1364_v21 = vld [vmem:[%s1839_s9 + $0x54] ss:$8 sps:$4 sm:$0xff]   ;;  %v1367_v23 = vld [vmem:[%s1839_s9 + $0x50] ss:$8 sps:$4 sm:$0xff]  }
  0x7f   : > { %631 = vmatprep.mubr.bf16.mxu1 %v1361_v12  ;;  %v1359_v19 = vld [vmem:[%s1839_s9 + $0x40] ss:$8 sps:$4 sm:$0xff]   ;;  %v1368_v24 = vld [vmem:[%s1839_s9 + $0x24] ss:$8 sps:$4 sm:$0xff]   ;;  %v1374_v28 = vld [vmem:[%s1839_s9 + $0x34] ss:$8 sps:$4 sm:$0xff]  }
  0x80   : > { %v1370_v25 = vld [vmem:[%s1839_s9 + $0x64] ss:$8 sps:$4 sm:$0xff]   ;;  %v1372_v26 = vld [vmem:[%s1839_s9 + $0x20] ss:$8 sps:$4 sm:$0xff]   ;;  %v1376_v29 = vld [vmem:[%s1839_s9 + $0x74] ss:$8 sps:$4 sm:$0xff]  }
  0x81   : > { %1173 = vmatpush3.bf16.msra.mxu0 %v1345_v5  ;;  %1242 = vmatpush3.bf16.msra.mxu1 %v1345_v5  ;;  %v1373_v27 = vld [vmem:[%s1839_s9 + $0x60] ss:$8 sps:$4 sm:$0xff]   ;;  %v1378_v30 = vld [vmem:[%s1839_s9 + $0x30] ss:$8 sps:$4 sm:$0xff]  }
  0x82   : > { %1174 = vmatprep.subr.bf16.mxu0 %v1346_v6  ;;  %1235 = vmatprep.subr.bf16.mxu1 %v1346_v6  ;;  %v1379_v31 = vld [vmem:[%s1839_s9 + $0x70] ss:$8 sps:$4 sm:$0xff]   ;;  %v795_v40 = vld [vmem:[%s1850_s8] sm:$0xff]  ;;  %v796_v46 = vld [vmem:[%s1850_s8 + $0x8] sm:$0xff]  ;;  %s1468_s9 = scalar_lea.vmem %s1921_s7, 2048 }
  0x83   : > { %v803_v41 = vld [vmem:[%s1850_s8 + $0x40] sm:$0xff]  ;;  %v804_v47 = vld [vmem:[%s1850_s8 + $0x48] sm:$0xff]  ;;  %v797_v62 = vld [vmem:[%s1850_s8 + $0x10] sm:$0xff]  ;;  %p1469_p2 = scmp.ne.s32.totalorder %s1921_s7, %s1468_s9 }
  0x84   : > { %v805_v63 = vld [vmem:[%s1850_s8 + $0x50] sm:$0xff]  ;;  %v798_v4 = vld [vmem:[%s1850_s8 + $0x18] sm:$0xff] }
  0x85   : > { %1175 = vmatpush3.bf16.msra.mxu0 %v1347_v7  ;;  %1243 = vmatpush3.bf16.msra.mxu1 %v1347_v7  ;;  %v806_v5 = vld [vmem:[%s1850_s8 + $0x58] sm:$0xff]  ;;  %p1470_p12 = pnand %p1469_p2, %p2030_p7 }
  0x86   : > { %1176 = vmatprep.subr.bf16.mxu0 %v1348_v8  ;;  %1236 = vmatprep.subr.bf16.mxu1 %v1348_v8 }
  0x87   : > { %p1471_p0 = pneg %p1470_p12 }
  0x89   : > { %1177 = vmatpush3.bf16.msra.mxu0 %v1349_v9  ;;  %1244 = vmatpush3.bf16.msra.mxu1 %v1349_v9 }
  0x8a   : > { %1178 = vmatprep.subr.bf16.mxu0 %v1350_v10  ;;  %1237 = vmatprep.subr.bf16.mxu1 %v1350_v10 }
  0x8d   : > { %1179 = vmatpush3.bf16.msra.mxu0 %v1351_v13  ;;  %1245 = vmatpush3.bf16.msra.mxu1 %v1351_v13 }
  0x8e   : > { %1180 = vmatprep.subr.bf16.mxu0 %v1352_v14  ;;  %1238 = vmatprep.subr.bf16.mxu1 %v1352_v14 }
  0x91   : > { %1181 = vmatpush3.bf16.msra.mxu0 %v1353_v15  ;;  %1246 = vmatpush3.bf16.msra.mxu1 %v1353_v15 }
  0x92   : > { %1182 = vmatprep.subr.bf16.mxu0 %v1354_v16  ;;  %1239 = vmatprep.subr.bf16.mxu1 %v1354_v16 }
  0x95   : > { %1183 = vmatpush3.bf16.msra.mxu0 %v1355_v17  ;;  %1247 = vmatpush3.bf16.msra.mxu1 %v1355_v17 }
  0x98   : > { %600 = vmatmul.mubr.bf16.vlgmr.msra.gmra.mrb[0].mxu0 %v1356_v18  ;;  %632 = vmatmul.mubr.bf16.vlgmr.msra.gmra.mrb[0].mxu1 %v1359_v19 }
  0x99   : > { %607 = vmatprep.mubr.bf16.mxu0 %v1362_v20  ;;  %639 = vmatprep.mubr.bf16.mxu1 %v1364_v21  ;;  %v799_v20 = vld [vmem:[%s1850_s8 + $0x20] sm:$0xff] }
  0x9a   : > { %v807_v21 = vld [vmem:[%s1850_s8 + $0x60] sm:$0xff] }
  0xa0   : > { %608 = vmatmul.mubr.bf16.gmra.mrb[4].mxu0 %v1366_v22  ;;  %640 = vmatmul.mubr.bf16.gmra.mrb[4].mxu1 %v1367_v23 }
  0xa1   : > { %615 = vmatprep.mubr.bf16.mxu0 %v1368_v24  ;;  %647 = vmatprep.mubr.bf16.mxu1 %v1370_v25 }
  0xa8   : > { %616 = vmatmul.mubr.bf16.gmra.mrb[8].mxu0 %v1372_v26  ;;  %648 = vmatmul.mubr.bf16.gmra.mrb[8].mxu1 %v1373_v27  ;;  %v800_v26 = vld [vmem:[%s1850_s8 + $0x28] sm:$0xff] }
  0xa9   : > { %623 = vmatprep.mubr.bf16.mxu0 %v1374_v28  ;;  %655 = vmatprep.mubr.bf16.mxu1 %v1376_v29  ;;  %v808_v27 = vld [vmem:[%s1850_s8 + $0x68] sm:$0xff] }
  0xb0   : > { %624 = vmatmul.mubr.bf16.gmra.mrb[12].mxu0 %v1378_v30  ;;  %656 = vmatmul.mubr.bf16.gmra.mrb[12].mxu1 %v1379_v31 }
 0x16b   : > { %v1184_v32 = vpop.f32.mrb[0].mxu0  ;;  %v1208_v33 = vpop.f32.mrb[0].mxu1 }
 0x16c   : > { %v1185_v34 = vpop.f32.mrb[1].mxu0  ;;  %v1209_v35 = vpop.f32.mrb[1].mxu1 }
 0x16d   : > { %v1186_v36 = vadd.f32 %v1185_v34, %v1184_v32  ;;  %v1210_v37 = vadd.f32 %v1209_v35, %v1208_v33  ;;  %v1187_v38 = vpop.f32.mrb[2].mxu0  ;;  %v1211_v39 = vpop.f32.mrb[2].mxu1 }
 0x16e   : > { %v1188_v42 = vpop.f32.mrb[3].mxu0  ;;  %v1212_v43 = vpop.f32.mrb[3].mxu1 }
 0x16f   : > { %v1189_v44 = vadd.f32 %v1188_v42, %v1187_v38  ;;  %v1213_v45 = vadd.f32 %v1212_v43, %v1211_v39  ;;  %v811_v48 = vadd.f32 %v1186_v36, %v795_v40  ;;  %v819_v49 = vadd.f32 %v1210_v37, %v803_v41  ;;  %v801_v42 = vld [vmem:[%s1850_s8 + $0x30] sm:$0xff] }
 0x170   : > { %v809_v43 = vld [vmem:[%s1850_s8 + $0x70] sm:$0xff] }
 0x171   : > { %827 = vst [vmem:[%s1878_s26] sm:$0xff] %v811_v48  ;;  %835 = vst [vmem:[%s1878_s26 + $0x40] sm:$0xff] %v819_v49  ;;  %v1124_v50 = vpack.c.bf16 %v1189_v44, %v1186_v36  ;;  %v812_v51 = vadd.f32 %v1189_v44, %v796_v46  ;;  %v1144_v52 = vpack.c.bf16 %v1213_v45, %v1210_v37  ;;  %v802_v48 = vld [vmem:[%s1850_s8 + $0x38] sm:$0xff] }
 0x172   : > { %v820_v53 = vadd.f32 %v1213_v45, %v804_v47  ;;  %v810_v49 = vld [vmem:[%s1850_s8 + $0x78] sm:$0xff]  ;;  %s1599_s8 = smov [#allocation8]  }
 0x173   : > { %v1190_v54 = vpop.f32.mrb[4].mxu0  ;;  %v1214_v55 = vpop.f32.mrb[4].mxu1  ;;  %1125 = vst [vmem:[%s1882_s25] sm:$0xff] %v1124_v50   ;;  %828 = vst [vmem:[%s1878_s26 + $0x8] sm:$0xff] %v812_v51  ;;  %s1472_s22 = sshll.u32 %s1599_s8, 4  ;;  %s1473_s22 = int_to_ptr.vmem [resolvable:$false] %s1472_s22 }
 0x174   : > { %v1191_v56 = vpop.f32.mrb[5].mxu0  ;;  %v1215_v57 = vpop.f32.mrb[5].mxu1  ;;  %1164 = vst [vmem:[%s1882_s25 + $0x20] sm:$0xff] %v1144_v52   ;;  %836 = vst [vmem:[%s1878_s26 + $0x48] sm:$0xff] %v820_v53  ;;  %s1474_s13 = scalar_lea.vmem %s1473_s22, 4096  ;;  %p1475_p3 = scmp.lt.s32.totalorder %s1921_s7, %s1473_s22 }
 0x175   : > { %v1192_v58 = vadd.f32 %v1191_v56, %v1190_v54  ;;  %v1216_v59 = vadd.f32 %v1215_v57, %v1214_v55  ;;  %v1193_v60 = vpop.f32.mrb[6].mxu0  ;;  %v1217_v61 = vpop.f32.mrb[6].mxu1  ;;  %p1476_p4 = scmp.lt.s32.totalorder %s1474_s13, %s1468_s9 }
 0x176   : > { %v1194_v0 = vpop.f32.mrb[7].mxu0  ;;  %v1218_v1 = vpop.f32.mrb[7].mxu1 }
 0x177   : > { %v1195_v2 = vadd.f32 %v1194_v0, %v1193_v60  ;;  %v1219_v3 = vadd.f32 %v1218_v1, %v1217_v61  ;;  %v813_v6 = vadd.f32 %v1192_v58, %v797_v62  ;;  %v821_v7 = vadd.f32 %v1216_v59, %v805_v63  ;;  %p1477_p5 = por %p1476_p4, %p1475_p3 }
 0x179   : > { %829 = vst [vmem:[%s1878_s26 + $0x10] sm:$0xff] %v813_v6  ;;  %837 = vst [vmem:[%s1878_s26 + $0x50] sm:$0xff] %v821_v7  ;;  %v1129_v8 = vpack.c.bf16 %v1195_v2, %v1192_v58  ;;  %v814_v9 = vadd.f32 %v1195_v2, %v798_v4  ;;  %v1149_v10 = vpack.c.bf16 %v1219_v3, %v1216_v59  ;;  %p1478_p11 = pnand %p1477_p5, %p1471_p0 }
 0x17a   : > { %v822_v11 = vadd.f32 %v1219_v3, %v806_v5 }
 0x17b   : > { %v1196_v12 = vpop.f32.mrb[8].mxu0  ;;  %v1220_v13 = vpop.f32.mrb[8].mxu1  ;;  %1161 = vst [vmem:[%s1882_s25 + $0x8] sm:$0xff] %v1129_v8   ;;  %830 = vst [vmem:[%s1878_s26 + $0x18] sm:$0xff] %v814_v9 }
 0x17c   : > { %v1197_v14 = vpop.f32.mrb[9].mxu0  ;;  %v1221_v15 = vpop.f32.mrb[9].mxu1  ;;  %1165 = vst [vmem:[%s1882_s25 + $0x28] sm:$0xff] %v1149_v10   ;;  %838 = vst [vmem:[%s1878_s26 + $0x58] sm:$0xff] %v822_v11 }
 0x17d   : > { %v1198_v16 = vadd.f32 %v1197_v14, %v1196_v12  ;;  %v1222_v17 = vadd.f32 %v1221_v15, %v1220_v13  ;;  %v1199_v18 = vpop.f32.mrb[10].mxu0  ;;  %v1223_v19 = vpop.f32.mrb[10].mxu1 }
 0x17e   : > { %v1200_v22 = vpop.f32.mrb[11].mxu0  ;;  %v1224_v23 = vpop.f32.mrb[11].mxu1 }
 0x17f   : > { %v1201_v24 = vadd.f32 %v1200_v22, %v1199_v18  ;;  %v1225_v25 = vadd.f32 %v1224_v23, %v1223_v19  ;;  %v815_v28 = vadd.f32 %v1198_v16, %v799_v20  ;;  %v823_v29 = vadd.f32 %v1222_v17, %v807_v21 }
 0x181   : > { %831 = vst [vmem:[%s1878_s26 + $0x20] sm:$0xff] %v815_v28  ;;  %839 = vst [vmem:[%s1878_s26 + $0x60] sm:$0xff] %v823_v29  ;;  %v1134_v30 = vpack.c.bf16 %v1201_v24, %v1198_v16  ;;  %v816_v31 = vadd.f32 %v1201_v24, %v800_v26  ;;  %v1154_v32 = vpack.c.bf16 %v1225_v25, %v1222_v17 }
 0x182   : > { %v824_v33 = vadd.f32 %v1225_v25, %v808_v27 }
 0x183   : > { %v1202_v34 = vpop.f32.mrb[12].mxu0  ;;  %v1226_v35 = vpop.f32.mrb[12].mxu1  ;;  %1162 = vst [vmem:[%s1882_s25 + $0x10] sm:$0xff] %v1134_v30   ;;  %832 = vst [vmem:[%s1878_s26 + $0x28] sm:$0xff] %v816_v31 }
 0x184   : > { %v1203_v36 = vpop.f32.mrb[13].mxu0  ;;  %v1227_v37 = vpop.f32.mrb[13].mxu1  ;;  %1166 = vst [vmem:[%s1882_s25 + $0x30] sm:$0xff] %v1154_v32   ;;  %840 = vst [vmem:[%s1878_s26 + $0x68] sm:$0xff] %v824_v33 }
 0x185   : > { %v1204_v38 = vadd.f32 %v1203_v36, %v1202_v34  ;;  %v1228_v39 = vadd.f32 %v1227_v37, %v1226_v35  ;;  %v1205_v40 = vpop.f32.mrb[14].mxu0  ;;  %v1229_v41 = vpop.f32.mrb[14].mxu1 }
 0x186   : > { %v1206_v44 = vpop.f32.mrb[15].mxu0  ;;  %v1230_v45 = vpop.f32.mrb[15].mxu1 }
 0x187   : > { %v1207_v46 = vadd.f32 %v1206_v44, %v1205_v40  ;;  %v1231_v47 = vadd.f32 %v1230_v45, %v1229_v41  ;;  %v817_v50 = vadd.f32 %v1204_v38, %v801_v42  ;;  %v825_v51 = vadd.f32 %v1228_v39, %v809_v43 }
 0x189   : > { %833 = vst [vmem:[%s1878_s26 + $0x30] sm:$0xff] %v817_v50  ;;  %841 = vst [vmem:[%s1878_s26 + $0x70] sm:$0xff] %v825_v51  ;;  %v1139_v52 = vpack.c.bf16 %v1207_v46, %v1204_v38  ;;  %v818_v53 = vadd.f32 %v1207_v46, %v802_v48  ;;  %v1159_v54 = vpack.c.bf16 %v1231_v47, %v1228_v39 }
 0x18a   : > { %v826_v55 = vadd.f32 %v1231_v47, %v810_v49 }
 0x18b   : > { %1163 = vst [vmem:[%s1882_s25 + $0x18] sm:$0xff] %v1139_v52   ;;  %834 = vst [vmem:[%s1878_s26 + $0x38] sm:$0xff] %v818_v53 }
 0x18c   : > { %1167 = vst [vmem:[%s1882_s25 + $0x38] sm:$0xff] %v1159_v54   ;;  %842 = vst [vmem:[%s1878_s26 + $0x78] sm:$0xff] %v826_v55 }
 0x18d   : > { %1481 = shalt.err (!%p1478_p11)
}
 0x18e   : > { %s1482_s26 = scalar_lea.hbm %s1915_s30, 2048  ;;  %s1486_s14 = scalar_lea.hbm %s2010_s3, 4096 }
 0x18f   : > { %p1483_p9 = scmp.ne.s32.totalorder %s1915_s30, %s1482_s26  ;;  %p1487_p13 = scmp.lt.u32.totalorder %s1915_s30, %s2010_s3 }
 0x190   : > { %p1488_p10 = scmp.lt.u32.totalorder %s1486_s14, %s1482_s26  ;;  %p1490_p2 = scmp.lt.u32.totalorder %s1482_s26, %s1915_s30 }
 0x191   : > { %p1484_p8 = pnand %p1483_p9, %p2030_p7 }
 0x192   : > { %p1489_p1 = por %p1488_p10, %p1487_p13 }
 0x193   : > { %p1485_p6 = pneg %p1484_p8 }
 0x194   : > { %p1491_p12 = por %p1490_p2, %p1489_p1 }
 0x196   : > { %p1492_p0 = pnand %p1491_p12, %p1485_p6 }
 0x198   : > { %1495 = shalt.err (!%p1492_p0)
}
 0x199   : > { %s1600_s10 = smov 128   ;;  %s1601_s9 = smov 8  }
 0x19a   : > { %1256 = dma.vmem_to_hbm [thread:$0]  (%p2030_p7), %s1921_s7, 2048, %s1915_s30, %s844_s11, %s1600_s10, %s1600_s10, %s1601_s9  }
 0x19b   : > { %s849_s8 = scalar_lea.sflag [#allocation10], %s1833_s6  ;;  %s1496_s22 = scalar_lea.vmem %s1930_s23, 1024 }
 0x19c   : > { %p1497_p3 = scmp.ne.s32.totalorder %s1930_s23, %s1496_s22  ;;  %s1602_s13 = smov [#allocation9]  }
 0x19d   : > { %s1500_s26 = sshll.u32 %s1602_s13, 4  ;;  %s1501_s26 = int_to_ptr.vmem [resolvable:$false] %s1500_s26 }
 0x19e   : > { %p1498_p4 = pnand %p1497_p3, %p2030_p7  ;;  %s1502_s25 = scalar_lea.vmem %s1501_s26, 2048 }
 0x19f   : > { %p1503_p11 = scmp.lt.s32.totalorder %s1930_s23, %s1501_s26  ;;  %p1504_p9 = scmp.lt.s32.totalorder %s1502_s25, %s1496_s22 }
 0x1a0   : > { %p1499_p5 = pneg %p1498_p4 }
 0x1a1   : > { %p1505_p8 = por %p1504_p9, %p1503_p11 }
 0x1a3   : > { %p1506_p6 = pnand %p1505_p8, %p1499_p5 }
 0x1a5   : > { %1509 = shalt.err (!%p1506_p6)
}
 0x1a6   : > { %s1510_s7 = scalar_lea.hbm %s1928_s18, 1024  ;;  %s1514_s12 = scalar_lea.hbm %s2011_s4, 2048 }
 0x1a7   : > { %p1511_p13 = scmp.ne.s32.totalorder %s1928_s18, %s1510_s7  ;;  %p1515_p2 = scmp.lt.u32.totalorder %s1928_s18, %s2011_s4 }
 0x1a8   : > { %p1516_p12 = scmp.lt.u32.totalorder %s1514_s12, %s1510_s7  ;;  %p1518_p3 = scmp.lt.u32.totalorder %s1510_s7, %s1928_s18 }
 0x1a9   : > { %p1512_p10 = pnand %p1511_p13, %p2030_p7 }
 0x1aa   : > { %p1517_p0 = por %p1516_p12, %p1515_p2 }
 0x1ab   : > { %p1513_p1 = pneg %p1512_p10 }
 0x1ac   : > { %p1519_p4 = por %p1518_p3, %p1517_p0 }
 0x1ae   : > { %p1520_p5 = pnand %p1519_p4, %p1513_p1 }
 0x1b0   : > { %1523 = shalt.err (!%p1520_p5)
}
 0x1b1   : > { %s1603_s24 = smov 64   ;;  %s1604_s10 = smov 4  }
 0x1b2   : > { %1257 = dma.vmem_to_hbm [thread:$0]  (%p2030_p7), %s1930_s23, 1024, %s1928_s18, %s849_s8, %s1603_s24, %s1603_s24, %s1604_s10  }
 0x1b3 PF: > { %s893_s9 = sand.u32 1, %s1570_s15   ;;  %p2031_p11 = scmp.ne.s32.totalorder %s2020_s5, 0 }
 0x1b4   : > { %p2032_p9 = scmp.ge.s32.totalorder %s1590_s20, 2  ;;  %s894_s22 = scalar_lea.sflag [#allocation4], %s893_s9 }
 0x1b6   : > { %p1272_p8 = pnand %p2032_p9, %p2031_p11 }
 0x1b8   : > { %1561 = dma.done.wait (!%p1272_p8), %s894_s22, 2048  }
 0x1b9   : > { %1563 = vsyncadd (!%p1272_p8), %s894_s22, 4294965248  ;;  %s903_s13 = scalar_lea.sflag [#allocation10], %s893_s9 }
 0x1ba   : > { %1565 = dma.done.wait (!%p1272_p8), %s903_s13, 1024  }
 0x1bb   : > { %1567 = vsyncadd (!%p1272_p8), %s903_s13, 4294966272  ;;  %s25_s20 = sadd.s32 1, %s1590_s20   ;;  %s2033_s15 = smov %s1574_s16 }
 0x1bc   : > { %p22_p6 = scmp.ge.s32.totalorder %s25_s20, 4   ;;  %s2034_s16 = smov %s1578_s17 }
 0x1bd   : > { %s2035_s17 = smov %s1678_s27  ;;  %s2036_s18 = smov %s1586_s19 }
 0x1be   : > { %s2037_s19 = smov %s2039_s21  ;;  %24 = sbr.rel (!%p22_p6) target bundleno = 9 (0x9), region = 118 }
 0x1c5   :  { %908 = vsyncpa [#allocation3], 1 }
 0x1c6   :  { %910 = vsyncpa [#allocation3 + $0x1], 1 }
 0x1c7   :  { %911 = vsyncpa [#allocation6], 1 }
 0x1c8   :  { %912 = vsyncpa [#allocation4], 1 }
 0x1c9   :  { %914 = vsyncpa [#allocation4 + $0x1], 1 }
 0x1ca   :  { %915 = vsyncpa [#allocation10], 1 }
 0x1cb   :  { %917 = vsyncpa [#allocation10 + $0x1], 1 }

</bundles_post_ra>
